<compile_context>
chip_gen: v6e
topology: v6e:2x2x1
jax: 0.10.0
libtpu: 0.0.40
codegen_flags: <defaults>
</compile_context>

<pallas_src>
import jax
import jax.numpy as jnp
from jax import lax
from jax.experimental import pallas as pl
from jax.experimental.pallas import tpu as pltpu


def _make_kernel(margin, n_total, use_bf16_gram):
    inv_n = 1.0 / float(n_total)

    def kernel(xb_ref, xfull_ref, trow_ref, tcol_ref, loss_ref):
        # xb_ref:    (block_m, d) f32  anchor rows for this grid step
        # xfull_ref: (n, d)       f32  all rows (candidates), resident block
        # trow_ref:  (block_m, 1) i32  labels of the anchor rows
        # tcol_ref:  (1, n)       i32  labels of all rows
        # loss_ref:  (1, 1)       f32  SMEM scalar, accumulated across the grid

        @pl.when(pl.program_id(0) == 0)
        def _init():
            loss_ref[0, 0] = jnp.float32(0.0)

        xb = xb_ref[...]
        xf = xfull_ref[...]

        # Gram block: contraction on the last axis of both operands
        # (A . A^T expressed without materializing a transpose).
        dn = (((1,), (1,)), ((), ()))
        if use_bf16_gram:
            gram = lax.dot_general(
                xb.astype(jnp.bfloat16), xf.astype(jnp.bfloat16),
                dimension_numbers=dn, preferred_element_type=jnp.float32)
        else:
            gram = lax.dot_general(
                xb, xf, dimension_numbers=dn,
                preferred_element_type=jnp.float32)

        # Row squared norms of this block: (block_m, 1).
        sq_row = jnp.sum(xb * xb, axis=1, keepdims=True)
        # Column squared norms as a (1, n) row via a tiny MXU contraction
        # (avoids any (n,1)->(1,n) cross-lane relayout).
        ones_row = jnp.ones((1, xf.shape[1]), dtype=jnp.float32)
        sq_col = lax.dot_general(ones_row, xf * xf, dimension_numbers=dn,
                                 preferred_element_type=jnp.float32)

        # Squared pairwise distances for this row block: (block_m, n).
        d2 = sq_row + sq_col - 2.0 * gram

        # mask[i, j] = (label_i == label_j) -- pure broadcast, no transpose.
        mask = trow_ref[...] == tcol_ref[...]

        neg_inf = jnp.float32(-jnp.inf)
        pos_inf = jnp.float32(jnp.inf)

        # Hard mining on squared distances (sqrt / clamp are monotone, so the
        # selected pairs are identical to mining on the true distances).
        d2_ap = jnp.max(jnp.where(mask, d2, neg_inf), axis=1, keepdims=True)
        d2_an = jnp.min(jnp.where(mask, pos_inf, d2), axis=1, keepdims=True)

        dist_ap = jnp.sqrt(jnp.maximum(d2_ap, 1e-12))   # (block_m, 1)
        dist_an = jnp.sqrt(jnp.maximum(d2_an, 1e-12))   # (block_m, 1)

        # MarginRankingLoss with y = 1, mean reduction over all n anchors.
        per_anchor = jnp.maximum(dist_ap - dist_an + jnp.float32(margin), 0.0)
        loss_ref[0, 0] = loss_ref[0, 0] + jnp.sum(per_anchor) * jnp.float32(inv_n)

    return kernel


def _pick_block_m(n):
    """Anchor-row tile: whole batch when small, else a divisor multiple of 8."""
    if n <= 256:
        return n
    for bm in (256, 128, 64, 32, 16, 8):
        if n % bm == 0:
            return bm
    return n  # fallback: single block (n not a multiple of 8)


def ori_triplet_loss(inputs, targets, margin=0.3):
    """inputs: (n, feat_dim) float32; targets: (n,) int labels. Returns scalar loss."""
    inputs = inputs.astype(jnp.float32)
    n, d = inputs.shape
    t = targets.astype(jnp.int32)
    t_row = t.reshape(n, 1)
    t_col = t.reshape(1, n)

    block_m = _pick_block_m(n)
    num_blocks = n // block_m
    # bf16 Gram only pays off at realistic feature dims; keep f32 for small d
    # (also keeps the tight reference tolerance valid at the demo size).
    use_bf16_gram = d >= 256

    cost = pl.CostEstimate(
        flops=2 * n * n * d + 2 * n * d,
        transcendentals=2 * n,
        bytes_accessed=4 * (2 * n * d + 2 * n) + 4,
    )

    # Rough VMEM footprint: x block + resident full x + the (block_m, n) slabs.
    # Only raise the scoped limit when the default (16 MiB v5e / 32 MiB v6e,v7x)
    # could be exceeded.
    vmem_est = 4 * (2 * block_m * d + n * d + 4 * block_m * n)
    compiler_kwargs = dict(dimension_semantics=("arbitrary",))
    if vmem_est > (12 << 20):
        compiler_kwargs["vmem_limit_bytes"] = min(2 * vmem_est, 100 << 20)

    loss = pl.pallas_call(
        _make_kernel(margin, n, use_bf16_gram),
        grid=(num_blocks,),
        in_specs=[
            pl.BlockSpec((block_m, d), lambda i: (i, 0)),  # anchor row block
            pl.BlockSpec((n, d), lambda i: (0, 0)),        # full x (resident)
            pl.BlockSpec((block_m, 1), lambda i: (i, 0)),  # labels (column shape)
            pl.BlockSpec((1, n), lambda i: (0, 0)),        # labels (row shape)
        ],
        out_specs=pl.BlockSpec(memory_space=pltpu.SMEM),   # scalar loss in SMEM
        out_shape=jax.ShapeDtypeStruct((1, 1), jnp.float32),
        compiler_params=pltpu.CompilerParams(**compiler_kwargs),
        cost_estimate=cost,
    )(inputs, inputs, t_row, t_col)
    return loss[0, 0]


if __name__ == "__main__":
    key = jax.random.PRNGKey(0)
    n, feat_dim = 8, 32

    # Deterministic inputs: 4 classes, 2 samples each.
    x = jax.random.normal(key, (n, feat_dim), dtype=jnp.float32)
    targets = jnp.array([0, 0, 1, 1, 2, 2, 3, 3], dtype=jnp.int32)

    loss = ori_triplet_loss(x, targets, margin=0.3)
    jax.block_until_ready(loss)

    # Pure-JAX reference (same math as the PyTorch module) for a silent check.
    sq = jnp.sum(x * x, axis=1, keepdims=True)
    dist = jnp.sqrt(jnp.maximum(sq + sq.T - 2.0 * (x @ x.T), 1e-12))
    mask = targets[:, None] == targets[None, :]
    d_ap = jnp.max(jnp.where(mask, dist, -jnp.inf), axis=1)
    d_an = jnp.min(jnp.where(mask, jnp.inf, dist), axis=1)
    ref = jnp.mean(jnp.maximum(d_ap - d_an + 0.3, 0.0))
    assert jnp.allclose(loss, ref, atol=1e-5, rtol=1e-5), (loss, ref)

    print("KERNEL_OK")
</pallas_src>

<mosaic_0001>
module attributes {stable_mosaic.version = 11 : i64} {
  func.func @kernel(%arg0: i32, %arg1: memref<8x32xf32, #tpu.memory_space<vmem>>, %arg2: memref<8x32xf32, #tpu.memory_space<vmem>>, %arg3: memref<8x1xi32, #tpu.memory_space<vmem>>, %arg4: memref<1x8xi32, #tpu.memory_space<vmem>>, %arg5: memref<1x1xf32, #tpu.memory_space<smem>>) attributes {dimension_semantics = [#tpu.dimension_semantics<arbitrary>], iteration_bounds = array<i64: 1>, scalar_prefetch = 0 : i64, scratch_operands = 0 : i64, tpu.core_type = #tpu.core_type<tc>, window_params = [{transform_indices = @transform_0, window_bounds = array<i64: 8, 32>}, {pipeline_mode = #tpu.pipeline_mode<synchronous>, transform_indices = @transform_1, window_bounds = array<i64: 8, 32>}, {transform_indices = @transform_2, window_bounds = array<i64: 8, 1>}, {pipeline_mode = #tpu.pipeline_mode<synchronous>, transform_indices = @transform_3, window_bounds = array<i64: 1, 8>}, {transform_indices = @transform_4, window_bounds = array<i64: 1, 1>}]} {
    %c0_i32 = arith.constant 0 : i32
    %0 = arith.cmpi eq, %arg0, %c0_i32 : i32
    %1 = arith.extui %0 : i1 to i32
    %c0_i32_0 = arith.constant 0 : i32
    %2 = arith.cmpi ne, %1, %c0_i32_0 : i32
    scf.if %2 {
      %cst_26 = arith.constant 0.000000e+00 : f32
      %c0_27 = arith.constant 0 : index
      %c0_28 = arith.constant 0 : index
      %50 = memref.load %arg5[%c0_27, %c0_28] : memref<1x1xf32, #tpu.memory_space<smem>>
      memref.store %cst_26, %arg5[%c0_27, %c0_28] : memref<1x1xf32, #tpu.memory_space<smem>>
    } else {
    }
    %c0 = arith.constant 0 : index
    %c0_1 = arith.constant 0 : index
    %3 = vector.load %arg1[%c0, %c0_1] : memref<8x32xf32, #tpu.memory_space<vmem>>, vector<8x32xf32>
    %c0_2 = arith.constant 0 : index
    %c0_3 = arith.constant 0 : index
    %4 = vector.load %arg2[%c0_2, %c0_3] : memref<8x32xf32, #tpu.memory_space<vmem>>, vector<8x32xf32>
    %cst = arith.constant dense<0.000000e+00> : vector<8x8xf32>
    %5 = tpu.matmul %3, %4, %cst {dimension_numbers = #tpu.dot_dimension_numbers<[1], [1], [0], [0], [0, 0, 1, 0], [], []>} : vector<8x32xf32>, vector<8x32xf32>, vector<8x8xf32> -> vector<8x8xf32>
    %6 = arith.mulf %3, %3 : vector<8x32xf32>
    %cst_4 = arith.constant dense<0.000000e+00> : vector<8xf32>
    %7 = vector.multi_reduction <add>, %6, %cst_4 [1] : vector<8x32xf32> to vector<8xf32>
    %8 = vector.shape_cast %7 : vector<8xf32> to vector<8x1xf32>
    %cst_5 = arith.constant 1.000000e+00 : f32
    %9 = vector.broadcast %cst_5 : f32 to vector<1x32xf32>
    %10 = arith.mulf %4, %4 : vector<8x32xf32>
    %cst_6 = arith.constant dense<0.000000e+00> : vector<1x8xf32>
    %11 = tpu.matmul %9, %10, %cst_6 {dimension_numbers = #tpu.dot_dimension_numbers<[1], [1], [0], [0], [0, 0, 1, 0], [], []>} : vector<1x32xf32>, vector<8x32xf32>, vector<1x8xf32> -> vector<1x8xf32>
    %12 = vector.broadcast %8 : vector<8x1xf32> to vector<8x8xf32>
    %13 = vector.broadcast %11 : vector<1x8xf32> to vector<8x8xf32>
    %14 = arith.addf %12, %13 : vector<8x8xf32>
    %cst_7 = arith.constant 2.000000e+00 : f32
    %15 = vector.broadcast %cst_7 : f32 to vector<8x8xf32>
    %16 = arith.mulf %15, %5 : vector<8x8xf32>
    %17 = arith.subf %14, %16 : vector<8x8xf32>
    %c0_8 = arith.constant 0 : index
    %c0_9 = arith.constant 0 : index
    %18 = vector.load %arg3[%c0_8, %c0_9] : memref<8x1xi32, #tpu.memory_space<vmem>>, vector<8x1xi32>
    %c0_10 = arith.constant 0 : index
    %c0_11 = arith.constant 0 : index
    %19 = vector.load %arg4[%c0_10, %c0_11] : memref<1x8xi32, #tpu.memory_space<vmem>>, vector<1x8xi32>
    %20 = vector.broadcast %18 : vector<8x1xi32> to vector<8x8xi32>
    %21 = vector.broadcast %19 : vector<1x8xi32> to vector<8x8xi32>
    %22 = arith.cmpi eq, %20, %21 : vector<8x8xi32>
    %cst_12 = arith.constant 0xFF800000 : f32
    %23 = vector.broadcast %cst_12 : f32 to vector<8x8xf32>
    %24 = arith.select %22, %17, %23 : vector<8x8xi1>, vector<8x8xf32>
    %cst_13 = arith.constant dense<0xFF800000> : vector<8xf32>
    %25 = vector.multi_reduction <maximumf>, %24, %cst_13 [1] : vector<8x8xf32> to vector<8xf32>
    %26 = vector.shape_cast %25 : vector<8xf32> to vector<8x1xf32>
    %cst_14 = arith.constant 0x7F800000 : f32
    %27 = vector.broadcast %cst_14 : f32 to vector<8x8xf32>
    %28 = arith.select %22, %27, %17 : vector<8x8xi1>, vector<8x8xf32>
    %cst_15 = arith.constant dense<0x7F800000> : vector<8xf32>
    %29 = vector.multi_reduction <minimumf>, %28, %cst_15 [1] : vector<8x8xf32> to vector<8xf32>
    %30 = vector.shape_cast %29 : vector<8xf32> to vector<8x1xf32>
    %cst_16 = arith.constant 9.99999996E-13 : f32
    %31 = vector.broadcast %cst_16 : f32 to vector<8x1xf32>
    %32 = arith.maximumf %26, %31 : vector<8x1xf32>
    %33 = math.sqrt %32 : vector<8x1xf32>
    %cst_17 = arith.constant 9.99999996E-13 : f32
    %34 = vector.broadcast %cst_17 : f32 to vector<8x1xf32>
    %35 = arith.maximumf %30, %34 : vector<8x1xf32>
    %36 = math.sqrt %35 : vector<8x1xf32>
    %37 = arith.subf %33, %36 : vector<8x1xf32>
    %cst_18 = arith.constant 3.000000e-01 : f32
    %38 = vector.broadcast %cst_18 : f32 to vector<8x1xf32>
    %39 = arith.addf %37, %38 : vector<8x1xf32>
    %cst_19 = arith.constant 0.000000e+00 : f32
    %40 = vector.broadcast %cst_19 : f32 to vector<8x1xf32>
    %41 = arith.maximumf %39, %40 : vector<8x1xf32>
    %c0_20 = arith.constant 0 : index
    %c0_21 = arith.constant 0 : index
    %42 = memref.load %arg5[%c0_20, %c0_21] : memref<1x1xf32, #tpu.memory_space<smem>>
    %43 = vector.shape_cast %41 : vector<8x1xf32> to vector<1x8x1xf32>
    %cst_22 = arith.constant dense<0.000000e+00> : vector<1xf32>
    %44 = vector.multi_reduction <add>, %43, %cst_22 [1, 2] : vector<1x8x1xf32> to vector<1xf32>
    %45 = vector.shape_cast %44 : vector<1xf32> to vector<1x1x1xf32>
    %46 = vector.extract %45[0, 0, 0] : f32 from vector<1x1x1xf32>
    %cst_23 = arith.constant 1.250000e-01 : f32
    %47 = arith.mulf %46, %cst_23 : f32
    %48 = arith.addf %42, %47 : f32
    %c0_24 = arith.constant 0 : index
    %c0_25 = arith.constant 0 : index
    %49 = memref.load %arg5[%c0_24, %c0_25] : memref<1x1xf32, #tpu.memory_space<smem>>
    memref.store %48, %arg5[%c0_24, %c0_25] : memref<1x1xf32, #tpu.memory_space<smem>>
    return
  }
  func.func @transform_0(%arg0: i32) -> (i32, i32) {
    %c0_i32 = arith.constant 0 : i32
    %c0_i32_0 = arith.constant 0 : i32
    return %arg0, %c0_i32 : i32, i32
  }
  func.func @transform_1(%arg0: i32) -> (i32, i32) {
    %c0_i32 = arith.constant 0 : i32
    %c0_i32_0 = arith.constant 0 : i32
    %c0_i32_1 = arith.constant 0 : i32
    return %c0_i32, %c0_i32_0 : i32, i32
  }
  func.func @transform_2(%arg0: i32) -> (i32, i32) {
    %c0_i32 = arith.constant 0 : i32
    %c0_i32_0 = arith.constant 0 : i32
    return %arg0, %c0_i32 : i32, i32
  }
  func.func @transform_3(%arg0: i32) -> (i32, i32) {
    %c0_i32 = arith.constant 0 : i32
    %c0_i32_0 = arith.constant 0 : i32
    %c0_i32_1 = arith.constant 0 : i32
    return %c0_i32, %c0_i32_0 : i32, i32
  }
  func.func @transform_4(%arg0: i32) -> (i32, i32) {
    %c0_i32 = arith.constant 0 : i32
    %c0_i32_0 = arith.constant 0 : i32
    %c0_i32_1 = arith.constant 0 : i32
    return %c0_i32, %c0_i32_0 : i32, i32
  }
}

</mosaic_0001>

<bundles_post_ra>
// kernel: tpu_custom_call.1
= control target key start
LH: loop header
LB: loop body
LE: loop exit
PB: predicated region body
PF: predicated region fallthrough
CT: control target
= control target key end

     0   :  { %9 = vsyncpa [#allocation3], 0  ;;  %s382_s0 = inlined_call_operand.vmem [shape: f32[8,32], index: 0, kind: input, shape index: {}]   ;;  %s383_s1 = inlined_call_operand.hbm [shape: f32[8,32], index: 1, kind: input, shape index: {}]   ;;  %s384_s2 = inlined_call_operand.vmem [shape: s32[8,1], index: 2, kind: input, shape index: {}]   ;;  %s385_s3 = inlined_call_operand.vmem [shape: s32[1,8], index: 3, kind: input, shape index: {}]   ;;  %s386_s4 = inlined_call_operand.hbm [shape: f32[1,1], index: 4, kind: output, shape index: {}]  }
   0x1   :  { %10 = vsyncpa [#allocation4], 0  ;;  %s336_s15 = smov [#allocation2]  }
   0x2   :  { %s19_s16 = sshll.u32 %s336_s15, 4  ;;  %s20_s16 = int_to_ptr.vmem [resolvable:$true] %s19_s16 }
   0x3   :  { %s312_s17 = scalar_lea.vmem %s20_s16, 128  ;;  %p317_p1 = scmp.lt.s32.totalorder %s20_s16, %s20_s16 }
   0x4   :  { %p313_p0 = scmp.ne.s32.totalorder %s20_s16, %s312_s17  ;;  %p318_p2 = scmp.lt.s32.totalorder %s312_s17, %s312_s17 }
   0x6   :  { %p319_p3 = por %p318_p2, %p317_p1 }
   0x8   :  { %p320_p4 = pnand %p319_p3, %p313_p0 }
   0xa   :  { %323 = shalt.err (!%p320_p4)
}
   0xb   :  { %22 = dma.hbm_to_vmem [thread:$0]  %s383_s1, 128, %s20_s16, [#allocation3]  }
   0xc   :  { %332 = dma.done.wait [#allocation3], 128  }
   0xd   :  { %333 = vsyncadd [#allocation3], 4294967168  ;;  %v337_v0 = vmov 0.0   ;;  %vm338_vm0 = vmmov 0   ;;  %v339_v1 = vmov 0   ;;  %vm38_vm1 = vcmask 261120  }
   0xe   :  { %280 = vmatprep.subr.mxu0 %v337_v0  ;;  %285 = vmatprep.subr.mxu1 %v337_v0  ;;  %v37_v2 = vld [vmem:[#allocation2] sm:$0xff]  ;;  %v340_v7 = vmov 1.0   ;;  %v196_v9 = vlaneseq  ;;  %vm214_vm3 = vcmask 64512   ;;  %vm242_vm8 = vcmask 7168   ;;  %s341_s24 = smov [#allocation5]  }
   0xf   :  { %282 = vmatprep.mubr.msk.f32.mxu0 %vm338_vm0, %v337_v0  ;;  %287 = vmatprep.mubr.msk.f32.mxu1 %vm338_vm0, %v337_v0  ;;  %v36_v3 = vld [vmem:[%s382_s0] sm:$0xff]  ;;  %v119_v4 = vmul.f32 %v37_v2, %v37_v2 }
  0x10   :  { %299 = vset.pattern.permute.xlu0 %v339_v1  ;;  %281 = vmatpush3.xpose.msk.msra.mxu0 %vm38_vm1, %v37_v2  ;;  %v115_v5 = vmul.f32 %v36_v3, %v36_v3  ;;  %v203_v8 = vld [vmem:[%s384_s2] sm:$0xff]  ;;  %v197_v10 = vshrl.u32 %v196_v9, 7 }
  0x11   :  { %286 = vmatpush3.xpose.msk.msra.mxu1 %vm38_vm1, %v119_v4  ;;  %v275_v18 = vld [vmem:[%s385_s3] ss:$0 sm:$0xff] }
  0x12   :  { %v116_v6 = vsel %vm38_vm1, %v115_v5, 0.0  ;;  %v198_v12 = vsub.s32 0, %v197_v10 }
  0x13   :  { %283 = vmatmul.mubr.msk.f32.vlgmr.msra.gmra.mxu0 %vm38_vm1, %v36_v3  ;;  %117 = vadd.xlane.f32.xlu0 %v116_v6 }
  0x14   :  { %288 = vmatmul.mubr.msk.f32.vlgmr.msra.gmra.mxu1 %vm38_vm1, %v340_v7 }
  0x29   :  { %206 = vperm.xlu0 %299, %v203_v8  }
  0x9c   :  { %v118_v11 = vpop.xlane.xlu0 %117 }
  0xa4   :  { %v207_v19 = vpop.permute.xlu0 %206 }
  0xa5   :  { %vm212_vm2 = vcmp.eq.s32.totalorder %v207_v19, %v275_v18 }
  0xd3   :  { %v111_v13 = vpop.f32.mrf.mxu0 }
  0xd4   :  { %v192_v14 = vpop.f32.mrf.mxu1  ;;  %v201_v16 = vmul.f32 2.0, %v111_v13 }
  0xd5   :  { %v284_v15 = vpop.f32.mrf.mxu0  ;;  %v199_v17 = vrot.slane %v192_v14, %v198_v12 }
  0xd6   :  { %v289_v20 = vpop.f32.mrf.mxu1 }
  0xd7   :  { %v200_v21 = vadd.f32 %v199_v17, %v118_v11 }
  0xd9   :  { %v202_v22 = vsub.f32 %v200_v21, %v201_v16 }
  0xdb   :  { %v213_v23 = vsel %vm212_vm2, %v202_v22, -inf  ;;  %v218_v25 = vsel %vm212_vm2, inf, %v202_v22 }
  0xdc   :  { %v215_v24 = vsel %vm214_vm3, %v213_v23, -inf  ;;  %v219_v26 = vsel %vm214_vm3, %v218_v25, inf }
  0xdd   :  { %216 = vmax.xlane.f32.xlu1 %v215_v24 }
  0xe1   :  { %220 = vmin.xlane.f32.xlu1 %v219_v26 }
 0x166   :  { %v217_v27 = vpop.xlane.xlu1 %216 }
 0x167   :  { %v222_v28 = vmax.f32 %v217_v27, 1e-12 }
 0x169   :  { %300 = vrsqrt.f32 %v222_v28  ;;  %vm225_vm4 = vcmp.eq.f32.partialorder %v222_v28, inf  ;;  %v228_v36 = vand.u32 2147483648, %v222_v28  ;;  %vm227_vm6 = vcmp.eq.f32.partialorder %v222_v28, 0.0 }
 0x16a   :  { %v221_v29 = vpop.xlane.xlu1 %220 }
 0x16b   :  { %v230_v30 = vmax.f32 %v221_v29, 1e-12 }
 0x16d   :  { %302 = vrsqrt.f32 %v230_v30  ;;  %vm233_vm5 = vcmp.eq.f32.partialorder %v230_v30, inf  ;;  %v236_v37 = vand.u32 2147483648, %v230_v30  ;;  %vm235_vm7 = vcmp.eq.f32.partialorder %v230_v30, 0.0 }
 0x176   :  { %v301_v31 = vpop.eup %300 }
 0x177   :  { %v224_v32 = vmul.f32 %v301_v31, %v222_v28 }
 0x179   :  { %v226_v34 = vsel %vm225_vm4, %v222_v28, %v224_v32 }
 0x17a   :  { %v303_v33 = vpop.eup %302  ;;  %v229_v39 = vsel %vm227_vm6, %v228_v36, %v226_v34 }
 0x17b   :  { %v232_v35 = vmul.f32 %v303_v33, %v230_v30 }
 0x17d   :  { %v234_v38 = vsel %vm233_vm5, %v230_v30, %v232_v35 }
 0x17e   :  { %v237_v40 = vsel %vm235_vm7, %v236_v37, %v234_v38 }
 0x17f   :  { %v238_v41 = vsub.f32 %v229_v39, %v237_v40 }
 0x181   :  { %v239_v42 = vadd.f32 0.3, %v238_v41 }
 0x183   :  { %v240_v43 = vmax.f32 %v239_v42, 0.0 }
 0x185   :  { %v243_v44 = vsel %vm242_vm8, %v240_v43, 0.0 }
 0x186   :  { %244 = vadd.xlane.f32.xlu1 %v243_v44 }
 0x20f   :  { %v245_v45 = vpop.xlane.xlu1 %244 }
 0x210   :  { %v246_v46 = vrot.slane %v245_v45, 4 }
 0x212   :  { %v247_v47 = vadd.f32 %v246_v46, %v245_v45 }
 0x214   :  { %v248_v48 = vrot.slane %v247_v47, 2 }
 0x216   :  { %v249_v49 = vadd.f32 %v248_v48, %v247_v47 }
 0x218   :  { %v250_v50 = vrot.slane %v249_v49, 1 }
 0x21a   :  { %v251_v51 = vadd.f32 %v250_v50, %v249_v49 }
 0x21c   :  { %290 = vpush %v251_v51 }
 0x24d   :  { %s291_s2 = spop %290 }
 0x24e   :  { %s253_s3 = smul.f32 0.125, %s291_s2 }
 0x250   :  { %256 = sst [smem:[#allocation5]] %s253_s3 }
 0x251   :  { %264 = dma.smem_to_hbm %s341_s24, 16, %s386_s4, [#allocation4]  }
 0x252   :  { %334 = dma.done.wait [#allocation4], 16  }
 0x253   :  { %335 = vsyncadd [#allocation4], 4294967280 }
 0x254   :  { %268 = sfence }
 0x255   :  { %269 = vsyncpa [#allocation3], 1 }
 0x256   :  { %270 = vsyncpa [#allocation4], 1 }

</bundles_post_ra>
